<compile_context>
chip_gen: v7x
topology: tpu7x:2x2x1
jax: 0.10.0
libtpu: 0.0.40
codegen_flags: <defaults>
</compile_context>

<pallas_src>
import jax
import jax.numpy as jnp
from jax.experimental import pallas as pl
from jax.experimental.pallas import tpu as pltpu

# Module hyper-parameters (from __init__)
CIN = 2
COUT = 2
K = 2
PAD = 20
OUT_PAD = 4
STRIDE = 1      # stride=1 -> no input dilation needed
LANE = 128      # batch tile on the lane axis


def _out_size(h):
    return (h - 1) * STRIDE - 2 * PAD + (K - 1) + OUT_PAD + 1


def convt_tanh_kernel(x_ref, w_ref, b_ref, o_ref):
    # x_ref: (CIN, Hw, Ww, TB)     cropped input window, batch on lanes, VMEM
    # w_ref: (CIN*COUT*K*K,)       flattened PyTorch weight [ci, co, kh, kw], SMEM
    # b_ref: (COUT,)               bias, SMEM
    # o_ref: (COUT, Ho, Wo, TB)    output block, batch on lanes, VMEM
    Ho, Wo, TB = o_ref.shape[1], o_ref.shape[2], o_ref.shape[3]

    # One accumulator per output channel, initialized with the bias.
    accs = [jnp.full((Ho, Wo, TB), b_ref[co], dtype=jnp.float32)
            for co in range(COUT)]

    # Loop order (ci, kh, kw) outer, co inner: each shifted window is
    # extracted exactly once and reused for both output channels.
    for ci in range(CIN):
        for kh in range(K):
            for kw in range(K):
                xs = x_ref[ci,
                           pl.ds(K - 1 - kh, Ho),
                           pl.ds(K - 1 - kw, Wo),
                           :]
                for co in range(COUT):
                    w_s = w_ref[((ci * COUT + co) * K + kh) * K + kw]
                    accs[co] = accs[co] + xs * w_s

    # Direct per-channel stores (no stack -> no relayout); tanh on the EUP.
    for co in range(COUT):
        o_ref[co] = jnp.tanh(accs[co])


def conv_transpose_tanh(x, w, b):
    """x: (N, CIN, H, W) f32, w: (CIN, COUT, K, K) f32, b: (COUT,) f32."""
    x = x.astype(jnp.float32)
    N, _, H, W = x.shape
    Ho, Wo = _out_size(H), _out_size(W)
    assert Ho > 0 and Wo > 0, "input spatial size too small for this conv config"

    # Only rows/cols [PAD-(K-1), PAD+Ho-1] of x are ever read; the crop is
    # folded into the same transpose that puts the batch on the lane axis.
    r0 = PAD - (K - 1)
    Hw, Ww = Ho + K - 1, Wo + K - 1

    # (N, CIN, H, W) -> crop -> (CIN, Hw, Ww, N) -> pad batch to multiple of 128.
    x_t = jnp.transpose(x[:, :, r0:r0 + Hw, r0:r0 + Ww], (1, 2, 3, 0))
    TB = LANE
    n_blocks = max(1, -(-N // TB))           # ceil(N / TB)
    N_pad = n_blocks * TB
    if N_pad != N:
        x_t = jnp.pad(x_t, ((0, 0), (0, 0), (0, 0), (0, N_pad - N)))

    w_flat = w.reshape(-1).astype(jnp.float32)

    out_t = pl.pallas_call(
        convt_tanh_kernel,
        out_shape=jax.ShapeDtypeStruct((COUT, Ho, Wo, N_pad), jnp.float32),
        grid=(n_blocks,),
        in_specs=[
            # Lane-dense per-batch-block view: full channel/spatial dims,
            # TB=128 samples on the lane axis.
            pl.BlockSpec((CIN, Hw, Ww, TB), lambda n: (0, 0, 0, n)),
            pl.BlockSpec(memory_space=pltpu.MemorySpace.SMEM),   # weights (flat)
            pl.BlockSpec(memory_space=pltpu.MemorySpace.SMEM),   # bias
        ],
        out_specs=pl.BlockSpec((COUT, Ho, Wo, TB), lambda n: (0, 0, 0, n)),
        compiler_params=pltpu.CompilerParams(
            dimension_semantics=("parallel",)),
    )(x_t, w_flat, b.astype(jnp.float32))

    # (COUT, Ho, Wo, N_pad) -> (N, COUT, Ho, Wo)
    return jnp.transpose(out_t, (3, 0, 1, 2))[:N]


def reference(x, w, b):
    """Plain-JAX reference of the same conv_transpose + tanh semantics."""
    N, _, H, W = x.shape
    Ho, Wo = _out_size(H), _out_size(W)
    out = jnp.zeros((N, COUT, Ho, Wo), jnp.float32)
    for kh in range(K):
        for kw in range(K):
            xs = x[:, :, PAD - kh:PAD - kh + Ho, PAD - kw:PAD - kw + Wo]
            out = out + jnp.einsum("nchw,cd->ndhw", xs, w[:, :, kh, kw])
    return jnp.tanh(out + b[None, :, None, None])


if __name__ == "__main__":
    key = jax.random.PRNGKey(0)
    kx, kw, kb = jax.random.split(key, 3)

    # TODO(synk): the original 32x32 input (and output_padding=4 >= stride=1)
    # is rejected by PyTorch itself; 40x40 is the smallest clean spatial size
    # giving a positive (5x5) output while keeping the module's arithmetic.
    N, H, W = 1, 40, 40
    x = jax.random.normal(kx, (N, CIN, H, W), dtype=jnp.float32)

    # Deterministic parameter init (PyTorch-style uniform bound 1/sqrt(fan_in))
    fan_in = CIN * K * K
    bound = 1.0 / (fan_in ** 0.5)
    w = jax.random.uniform(kw, (CIN, COUT, K, K), jnp.float32, -bound, bound)
    b = jax.random.uniform(kb, (COUT,), jnp.float32, -bound, bound)

    out = conv_transpose_tanh(x, w, b)
    out = jax.block_until_ready(out)

    ref = reference(x, w, b)
    assert out.shape == (N, COUT, _out_size(H), _out_size(W))
    assert jnp.allclose(out, ref, atol=1e-5, rtol=1e-5)

    print("KERNEL_OK")
</pallas_src>

<mosaic_0001>
module attributes {stable_mosaic.version = 11 : i64} {
  func.func @convt_tanh_kernel(%arg0: i32, %arg1: memref<2x6x6x128xf32, #tpu.memory_space<vmem>>, %arg2: memref<16xf32, #tpu.memory_space<smem>>, %arg3: memref<2xf32, #tpu.memory_space<smem>>, %arg4: memref<2x5x5x128xf32, #tpu.memory_space<vmem>>) attributes {dimension_semantics = [#tpu.dimension_semantics<parallel>], iteration_bounds = array<i64: 1>, scalar_prefetch = 0 : i64, scratch_operands = 0 : i64, tpu.core_type = #tpu.core_type<tc>, window_params = [{transform_indices = @transform_0, window_bounds = array<i64: 2, 6, 6, 128>}, {transform_indices = @transform_1, window_bounds = array<i64: 16>}, {transform_indices = @transform_2, window_bounds = array<i64: 2>}, {transform_indices = @transform_3, window_bounds = array<i64: 2, 5, 5, 128>}]} {
    %c0 = arith.constant 0 : index
    %0 = memref.load %arg3[%c0] : memref<2xf32, #tpu.memory_space<smem>>
    %1 = vector.broadcast %0 : f32 to vector<5x5x128xf32>
    %c1 = arith.constant 1 : index
    %2 = memref.load %arg3[%c1] : memref<2xf32, #tpu.memory_space<smem>>
    %3 = vector.broadcast %2 : f32 to vector<5x5x128xf32>
    %c0_0 = arith.constant 0 : index
    %c1_1 = arith.constant 1 : index
    %c1_2 = arith.constant 1 : index
    %c0_3 = arith.constant 0 : index
    %4 = vector.load %arg1[%c0_0, %c1_1, %c1_2, %c0_3] : memref<2x6x6x128xf32, #tpu.memory_space<vmem>>, vector<1x5x5x128xf32>
    %5 = vector.shape_cast %4 : vector<1x5x5x128xf32> to vector<5x5x128xf32>
    %c0_4 = arith.constant 0 : index
    %6 = memref.load %arg2[%c0_4] : memref<16xf32, #tpu.memory_space<smem>>
    %7 = vector.broadcast %6 : f32 to vector<5x5x128xf32>
    %8 = arith.mulf %5, %7 : vector<5x5x128xf32>
    %9 = arith.addf %1, %8 : vector<5x5x128xf32>
    %c4 = arith.constant 4 : index
    %10 = memref.load %arg2[%c4] : memref<16xf32, #tpu.memory_space<smem>>
    %11 = vector.broadcast %10 : f32 to vector<5x5x128xf32>
    %12 = arith.mulf %5, %11 : vector<5x5x128xf32>
    %13 = arith.addf %3, %12 : vector<5x5x128xf32>
    %c0_5 = arith.constant 0 : index
    %c1_6 = arith.constant 1 : index
    %c0_7 = arith.constant 0 : index
    %c0_8 = arith.constant 0 : index
    %14 = vector.load %arg1[%c0_5, %c1_6, %c0_7, %c0_8] : memref<2x6x6x128xf32, #tpu.memory_space<vmem>>, vector<1x5x5x128xf32>
    %15 = vector.shape_cast %14 : vector<1x5x5x128xf32> to vector<5x5x128xf32>
    %c1_9 = arith.constant 1 : index
    %16 = memref.load %arg2[%c1_9] : memref<16xf32, #tpu.memory_space<smem>>
    %17 = vector.broadcast %16 : f32 to vector<5x5x128xf32>
    %18 = arith.mulf %15, %17 : vector<5x5x128xf32>
    %19 = arith.addf %9, %18 : vector<5x5x128xf32>
    %c5 = arith.constant 5 : index
    %20 = memref.load %arg2[%c5] : memref<16xf32, #tpu.memory_space<smem>>
    %21 = vector.broadcast %20 : f32 to vector<5x5x128xf32>
    %22 = arith.mulf %15, %21 : vector<5x5x128xf32>
    %23 = arith.addf %13, %22 : vector<5x5x128xf32>
    %c0_10 = arith.constant 0 : index
    %c0_11 = arith.constant 0 : index
    %c1_12 = arith.constant 1 : index
    %c0_13 = arith.constant 0 : index
    %24 = vector.load %arg1[%c0_10, %c0_11, %c1_12, %c0_13] : memref<2x6x6x128xf32, #tpu.memory_space<vmem>>, vector<1x5x5x128xf32>
    %25 = vector.shape_cast %24 : vector<1x5x5x128xf32> to vector<5x5x128xf32>
    %c2 = arith.constant 2 : index
    %26 = memref.load %arg2[%c2] : memref<16xf32, #tpu.memory_space<smem>>
    %27 = vector.broadcast %26 : f32 to vector<5x5x128xf32>
    %28 = arith.mulf %25, %27 : vector<5x5x128xf32>
    %29 = arith.addf %19, %28 : vector<5x5x128xf32>
    %c6 = arith.constant 6 : index
    %30 = memref.load %arg2[%c6] : memref<16xf32, #tpu.memory_space<smem>>
    %31 = vector.broadcast %30 : f32 to vector<5x5x128xf32>
    %32 = arith.mulf %25, %31 : vector<5x5x128xf32>
    %33 = arith.addf %23, %32 : vector<5x5x128xf32>
    %c0_14 = arith.constant 0 : index
    %c0_15 = arith.constant 0 : index
    %c0_16 = arith.constant 0 : index
    %c0_17 = arith.constant 0 : index
    %34 = vector.load %arg1[%c0_14, %c0_15, %c0_16, %c0_17] : memref<2x6x6x128xf32, #tpu.memory_space<vmem>>, vector<1x5x5x128xf32>
    %35 = vector.shape_cast %34 : vector<1x5x5x128xf32> to vector<5x5x128xf32>
    %c3 = arith.constant 3 : index
    %36 = memref.load %arg2[%c3] : memref<16xf32, #tpu.memory_space<smem>>
    %37 = vector.broadcast %36 : f32 to vector<5x5x128xf32>
    %38 = arith.mulf %35, %37 : vector<5x5x128xf32>
    %39 = arith.addf %29, %38 : vector<5x5x128xf32>
    %c7 = arith.constant 7 : index
    %40 = memref.load %arg2[%c7] : memref<16xf32, #tpu.memory_space<smem>>
    %41 = vector.broadcast %40 : f32 to vector<5x5x128xf32>
    %42 = arith.mulf %35, %41 : vector<5x5x128xf32>
    %43 = arith.addf %33, %42 : vector<5x5x128xf32>
    %c1_18 = arith.constant 1 : index
    %c1_19 = arith.constant 1 : index
    %c1_20 = arith.constant 1 : index
    %c0_21 = arith.constant 0 : index
    %44 = vector.load %arg1[%c1_18, %c1_19, %c1_20, %c0_21] : memref<2x6x6x128xf32, #tpu.memory_space<vmem>>, vector<1x5x5x128xf32>
    %45 = vector.shape_cast %44 : vector<1x5x5x128xf32> to vector<5x5x128xf32>
    %c8 = arith.constant 8 : index
    %46 = memref.load %arg2[%c8] : memref<16xf32, #tpu.memory_space<smem>>
    %47 = vector.broadcast %46 : f32 to vector<5x5x128xf32>
    %48 = arith.mulf %45, %47 : vector<5x5x128xf32>
    %49 = arith.addf %39, %48 : vector<5x5x128xf32>
    %c12 = arith.constant 12 : index
    %50 = memref.load %arg2[%c12] : memref<16xf32, #tpu.memory_space<smem>>
    %51 = vector.broadcast %50 : f32 to vector<5x5x128xf32>
    %52 = arith.mulf %45, %51 : vector<5x5x128xf32>
    %53 = arith.addf %43, %52 : vector<5x5x128xf32>
    %c1_22 = arith.constant 1 : index
    %c1_23 = arith.constant 1 : index
    %c0_24 = arith.constant 0 : index
    %c0_25 = arith.constant 0 : index
    %54 = vector.load %arg1[%c1_22, %c1_23, %c0_24, %c0_25] : memref<2x6x6x128xf32, #tpu.memory_space<vmem>>, vector<1x5x5x128xf32>
    %55 = vector.shape_cast %54 : vector<1x5x5x128xf32> to vector<5x5x128xf32>
    %c9 = arith.constant 9 : index
    %56 = memref.load %arg2[%c9] : memref<16xf32, #tpu.memory_space<smem>>
    %57 = vector.broadcast %56 : f32 to vector<5x5x128xf32>
    %58 = arith.mulf %55, %57 : vector<5x5x128xf32>
    %59 = arith.addf %49, %58 : vector<5x5x128xf32>
    %c13 = arith.constant 13 : index
    %60 = memref.load %arg2[%c13] : memref<16xf32, #tpu.memory_space<smem>>
    %61 = vector.broadcast %60 : f32 to vector<5x5x128xf32>
    %62 = arith.mulf %55, %61 : vector<5x5x128xf32>
    %63 = arith.addf %53, %62 : vector<5x5x128xf32>
    %c1_26 = arith.constant 1 : index
    %c0_27 = arith.constant 0 : index
    %c1_28 = arith.constant 1 : index
    %c0_29 = arith.constant 0 : index
    %64 = vector.load %arg1[%c1_26, %c0_27, %c1_28, %c0_29] : memref<2x6x6x128xf32, #tpu.memory_space<vmem>>, vector<1x5x5x128xf32>
    %65 = vector.shape_cast %64 : vector<1x5x5x128xf32> to vector<5x5x128xf32>
    %c10 = arith.constant 10 : index
    %66 = memref.load %arg2[%c10] : memref<16xf32, #tpu.memory_space<smem>>
    %67 = vector.broadcast %66 : f32 to vector<5x5x128xf32>
    %68 = arith.mulf %65, %67 : vector<5x5x128xf32>
    %69 = arith.addf %59, %68 : vector<5x5x128xf32>
    %c14 = arith.constant 14 : index
    %70 = memref.load %arg2[%c14] : memref<16xf32, #tpu.memory_space<smem>>
    %71 = vector.broadcast %70 : f32 to vector<5x5x128xf32>
    %72 = arith.mulf %65, %71 : vector<5x5x128xf32>
    %73 = arith.addf %63, %72 : vector<5x5x128xf32>
    %c1_30 = arith.constant 1 : index
    %c0_31 = arith.constant 0 : index
    %c0_32 = arith.constant 0 : index
    %c0_33 = arith.constant 0 : index
    %74 = vector.load %arg1[%c1_30, %c0_31, %c0_32, %c0_33] : memref<2x6x6x128xf32, #tpu.memory_space<vmem>>, vector<1x5x5x128xf32>
    %75 = vector.shape_cast %74 : vector<1x5x5x128xf32> to vector<5x5x128xf32>
    %c11 = arith.constant 11 : index
    %76 = memref.load %arg2[%c11] : memref<16xf32, #tpu.memory_space<smem>>
    %77 = vector.broadcast %76 : f32 to vector<5x5x128xf32>
    %78 = arith.mulf %75, %77 : vector<5x5x128xf32>
    %79 = arith.addf %69, %78 : vector<5x5x128xf32>
    %c15 = arith.constant 15 : index
    %80 = memref.load %arg2[%c15] : memref<16xf32, #tpu.memory_space<smem>>
    %81 = vector.broadcast %80 : f32 to vector<5x5x128xf32>
    %82 = arith.mulf %75, %81 : vector<5x5x128xf32>
    %83 = arith.addf %73, %82 : vector<5x5x128xf32>
    %84 = math.tanh %79 : vector<5x5x128xf32>
    %c0_34 = arith.constant 0 : index
    %c0_35 = arith.constant 0 : index
    %c0_36 = arith.constant 0 : index
    %c0_37 = arith.constant 0 : index
    %85 = vector.load %arg4[%c0_34, %c0_35, %c0_36, %c0_37] : memref<2x5x5x128xf32, #tpu.memory_space<vmem>>, vector<1x5x5x128xf32>
    %86 = vector.shape_cast %85 : vector<1x5x5x128xf32> to vector<5x5x128xf32>
    %87 = vector.shape_cast %84 : vector<5x5x128xf32> to vector<1x5x5x128xf32>
    tpu.vector_store %arg4[%c0_34, %c0_35, %c0_36, %c0_37], %87 {strides = array<i32>} : memref<2x5x5x128xf32, #tpu.memory_space<vmem>>, vector<1x5x5x128xf32>,
    %88 = math.tanh %83 : vector<5x5x128xf32>
    %c1_38 = arith.constant 1 : index
    %c0_39 = arith.constant 0 : index
    %c0_40 = arith.constant 0 : index
    %c0_41 = arith.constant 0 : index
    %89 = vector.load %arg4[%c1_38, %c0_39, %c0_40, %c0_41] : memref<2x5x5x128xf32, #tpu.memory_space<vmem>>, vector<1x5x5x128xf32>
    %90 = vector.shape_cast %89 : vector<1x5x5x128xf32> to vector<5x5x128xf32>
    %91 = vector.shape_cast %88 : vector<5x5x128xf32> to vector<1x5x5x128xf32>
    tpu.vector_store %arg4[%c1_38, %c0_39, %c0_40, %c0_41], %91 {strides = array<i32>} : memref<2x5x5x128xf32, #tpu.memory_space<vmem>>, vector<1x5x5x128xf32>,
    return
  }
  func.func @transform_0(%arg0: i32) -> (i32, i32, i32, i32) {
    %c0_i32 = arith.constant 0 : i32
    %c0_i32_0 = arith.constant 0 : i32
    %c0_i32_1 = arith.constant 0 : i32
    %c0_i32_2 = arith.constant 0 : i32
    return %c0_i32, %c0_i32_0, %c0_i32_1, %arg0 : i32, i32, i32, i32
  }
  func.func @transform_1(%arg0: i32) -> i32 {
    %c0_i32 = arith.constant 0 : i32
    %c0_i32_0 = arith.constant 0 : i32
    return %c0_i32 : i32
  }
  func.func @transform_2(%arg0: i32) -> i32 {
    %c0_i32 = arith.constant 0 : i32
    %c0_i32_0 = arith.constant 0 : i32
    return %c0_i32 : i32
  }
  func.func @transform_3(%arg0: i32) -> (i32, i32, i32, i32) {
    %c0_i32 = arith.constant 0 : i32
    %c0_i32_0 = arith.constant 0 : i32
    %c0_i32_1 = arith.constant 0 : i32
    %c0_i32_2 = arith.constant 0 : i32
    return %c0_i32, %c0_i32_0, %c0_i32_1, %arg0 : i32, i32, i32, i32
  }
}

</mosaic_0001>

<bundles_post_ra>
// kernel: tpu_custom_call.1
= control target key start
LH: loop header
LB: loop body
LE: loop exit
PB: predicated region body
PF: predicated region fallthrough
CT: control target
= control target key end

     0   :  { %8 = vsyncpa [#allocation3], 0  ;;  %s903_s0 = inlined_call_operand.vmem [shape: f32[2,6,6,128], index: 0, kind: input, shape index: {}]   ;;  %s904_s1 = inlined_call_operand.vmem [shape: f32[16], index: 1, kind: input, shape index: {}]   ;;  %s905_s2 = inlined_call_operand.vmem [shape: f32[2], index: 2, kind: input, shape index: {}]   ;;  %s906_s3 = inlined_call_operand.vmem [shape: f32[2,5,5,128], index: 3, kind: output, shape index: {}]  }
   0x1   :  { %s18_s14 = sshll.u32 %s904_s1, 4  ;;  %s19_s14 = int_to_ptr.vmem [resolvable:$true] %s18_s14 }
   0x2   :  { %9 = vsyncpa [#allocation5], 0  ;;  %s28_s17 = sshll.u32 %s905_s2, 4  ;;  %s378_s18 = scalar_lea.vmem %s19_s14, 16  ;;  %s29_s17 = int_to_ptr.vmem [resolvable:$true] %s28_s17 }
   0x3   :  { %p379_p0 = scmp.ne.s32.totalorder %s19_s14, %s378_s18  ;;  %p383_p1 = scmp.lt.s32.totalorder %s19_s14, %s19_s14 }
   0x4   :  { %p384_p2 = scmp.lt.s32.totalorder %s378_s18, %s378_s18 }
   0x6   :  { %p385_p3 = por %p384_p2, %p383_p1 }
   0x8   :  { %p386_p4 = pnand %p385_p3, %p379_p0 }
   0xa   :  { %389 = shalt.err (!%p386_p4)
}
   0xb   :  { %s406_s19 = smov [#allocation2]   ;;  %s390_s20 = scalar_lea.vmem %s29_s17, 16 }
   0xc   :  { %21 = dma.vmem_to_smem %s19_s14, 16, %s406_s19, [#allocation3]  }
   0xd   :  { %p391_p5 = scmp.ne.s32.totalorder %s29_s17, %s390_s20  ;;  %p395_p6 = scmp.lt.s32.totalorder %s29_s17, %s29_s17 }
   0xe   :  { %p396_p7 = scmp.lt.s32.totalorder %s390_s20, %s390_s20 }
  0x10   :  { %p397_p8 = por %p396_p7, %p395_p6 }
  0x12   :  { %p398_p9 = pnand %p397_p8, %p391_p5 }
  0x14   :  { %401 = shalt.err (!%p398_p9)
}
  0x15   :  { %s407_s1 = smov [#allocation4]  }
  0x16   :  { %31 = dma.vmem_to_smem %s29_s17, 16, %s407_s1, [#allocation5]  }
  0x17   :  { %402 = dma.done.wait [#allocation3], 16  }
  0x18   :  { %403 = vsyncadd [#allocation3], 4294967280 }
  0x19   :  { %404 = dma.done.wait [#allocation5], 16  }
  0x1a   :  { %405 = vsyncadd [#allocation5], 4294967280 }
  0x1b   :  { %38 = sfence }
  0x1c   :  { %s39_s2 = sld [smem:[#allocation4]]  ;;  %s317_s22 = sld [smem:[#allocation2 + $0x1]]  ;;  %v437_v0 = vld [vmem:[%s903_s0 + $0x9] sm:$0x1f]  ;;  %v447_v2 = vld [vmem:[%s903_s0 + $0x11] sm:$0x1f] }
  0x1d   :  { %s49_s21 = sld [smem:[#allocation2]]  ;;  %s319_s23 = sld [smem:[#allocation2 + $0x2]]  ;;  %v442_v1 = vld [vmem:[%s903_s0 + $0x8] sm:$0x1f]  ;;  %v456_v5 = vld [vmem:[%s903_s0 + $0x1] sm:$0x1f] }
  0x1e   :  { %s321_s24 = sld [smem:[#allocation2 + $0x3]]  ;;  %s328_s25 = sld [smem:[#allocation2 + $0x8]]  ;;  %v461_v6 = vld [vmem:[%s903_s0 + $0x10] sm:$0x1f]  ;;  %v470_v9 = vld [vmem:[%s903_s0] sm:$0x1f] }
  0x1f   :  { %s335_s28 = sld [smem:[#allocation2 + $0x9]]  ;;  %s342_s29 = sld [smem:[#allocation2 + $0xa]]  ;;  %v483_v14 = vld [vmem:[%s903_s0 + $0x39] sm:$0x1f]  ;;  %v500_v20 = vld [vmem:[%s903_s0 + $0x31] sm:$0x1f] }
  0x20   :  { %s349_s5 = sld [smem:[#allocation2 + $0xb]]  ;;  %v488_v15 = vld [vmem:[%s903_s0 + $0x38] sm:$0x1f]  ;;  %v505_v21 = vld [vmem:[%s903_s0 + $0x9] sm:$0x1f]  ;;  %s655_s4 = sld [smem:[#allocation4 + $0x1]] }
  0x21   :  { %v510_v22 = vld [vmem:[%s903_s0 + $0x8] sm:$0x1f]  ;;  %v519_v25 = vld [vmem:[%s903_s0 + $0x30] sm:$0x1f]  ;;  %v525_v27 = vld [vmem:[%s903_s0 + $0x41] sm:$0x1f] }
  0x22   :  { %v449_v3 = vstv %s39_s2  ;;  %v465_v8 = vstv %s317_s22  ;;  %v536_v32 = vld [vmem:[%s903_s0 + $0x40] sm:$0x1f]  ;;  %v541_v33 = vld [vmem:[%s903_s0 + $0x19] sm:$0x1f]  ;;  %s673_s9 = sld [smem:[#allocation2 + $0x4]]  ;;  %s690_s14 = sld [smem:[#allocation2 + $0x5]] }
  0x23   :  { %v451_v4 = vstv %s49_s21  ;;  %v80_v11 = vmul.f32 %v442_v1, %v465_v8  ;;  %v476_v12 = vstv %s319_s23  ;;  %v81_v16 = vmul.f32 %v461_v6, %v465_v8  ;;  %v546_v34 = vld [vmem:[%s903_s0 + $0x18] sm:$0x1f]  ;;  %v567_v41 = vld [vmem:[%s903_s0 + $0x11] sm:$0x1f]  ;;  %s701_s17 = sld [smem:[#allocation2 + $0x6]]  ;;  %s703_s18 = sld [smem:[#allocation2 + $0x7]] }
  0x24   :  { %v51_v7 = vmul.f32 %v437_v0, %v451_v4  ;;  %v52_v10 = vmul.f32 %v447_v2, %v451_v4  ;;  %v478_v13 = vstv %s321_s24  ;;  %v109_v18 = vmul.f32 %v476_v12, %v456_v5  ;;  %v557_v39 = vld [vmem:[%s903_s0 + $0x39] sm:$0x1f]  ;;  %v580_v46 = vld [vmem:[%s903_s0 + $0x10] sm:$0x1f]  ;;  %v585_v47 = vld [vmem:[%s903_s0 + $0x49] sm:$0x1f] }
  0x25   :  { %v495_v19 = vstv %s328_s25  ;;  %v512_v23 = vstv %s335_s28  ;;  %v514_v24 = vstv %s342_s29  ;;  %v138_v29 = vmul.f32 %v478_v13, %v470_v9  ;;  %v562_v40 = vld [vmem:[%s903_s0 + $0x38] sm:$0x1f]  ;;  %s728_s23 = sld [smem:[#allocation2 + $0xc]]  ;;  %s734_s24 = sld [smem:[#allocation2 + $0xd]] }
  0x26   :  { %v56_v17 = vadd.f32 %v51_v7, %v449_v3  ;;  %v57_v26 = vadd.f32 %v52_v10, %v449_v3  ;;  %v168_v30 = vmul.f32 %v483_v14, %v495_v19  ;;  %v531_v31 = vstv %s349_s5  ;;  %914 = vst [vmem:[#allocation8_spill] sm:$0xff] %v562_v40  ;;  %v596_v52 = vld [vmem:[%s903_s0 + $0x48] sm:$0x1f]  ;;  %v601_v53 = vld [vmem:[%s903_s0 + $0x21] sm:$0x1f]  ;;  %s748_s25 = sld [smem:[#allocation2 + $0xe]] }
  0x27   :  { %v197_v35 = vmul.f32 %v488_v15, %v512_v23  ;;  %v110_v37 = vmul.f32 %v476_v12, %v505_v21  ;;  %v139_v38 = vmul.f32 %v478_v13, %v510_v22  ;;  %v227_v43 = vmul.f32 %v500_v20, %v514_v24  ;;  %v606_v54 = vld [vmem:[%s903_s0 + $0x20] sm:$0x1f]  ;;  %v632_v10 = vld [vmem:[%s903_s0 + $0x19] sm:$0x1f]  ;;  %s760_s28 = sld [smem:[#allocation2 + $0xf]] }
  0x28   :  { %v85_v28 = vadd.f32 %v80_v11, %v56_v17  ;;  %v86_v36 = vadd.f32 %v81_v16, %v57_v26  ;;  %v573_v44 = vmul.f32 %v519_v25, %v531_v31  ;;  %v169_v45 = vmul.f32 %v525_v27, %v495_v19  ;;  %v617_v59 = vld [vmem:[%s903_s0 + $0x41] sm:$0x1f]  ;;  %v637_v11 = vld [vmem:[%s903_s0 + $0x18] sm:$0x1f] }
  0x29   :  { %v198_v49 = vmul.f32 %v536_v32, %v512_v23  ;;  %v53_v50 = vmul.f32 %v541_v33, %v451_v4  ;;  %v82_v51 = vmul.f32 %v546_v34, %v465_v8  ;;  %v228_v56 = vmul.f32 %v557_v39, %v514_v24  ;;  %915 = vst [vmem:[#allocation9_spill] sm:$0xff] %v617_v59  ;;  %v622_v60 = vld [vmem:[%s903_s0 + $0x40] sm:$0x1f] }
  0x2a   :  { %v114_v42 = vadd.f32 %v109_v18, %v85_v28  ;;  %v115_v48 = vadd.f32 %v110_v37, %v86_v36  ;;  %v257_v57 = vmul.f32 %v562_v40, %v531_v31  ;;  %v111_v58 = vmul.f32 %v476_v12, %v567_v41  ;;  %916 = vst [vmem:[#allocation10_spill] sm:$0xff] %v622_v60  ;;  %v648_v28 = vld [vmem:[%s903_s0 + $0x51] sm:$0x1f] }
  0x2b   :  { %v58_v62 = vadd.f32 %v53_v50, %v449_v3  ;;  %v140_v63 = vmul.f32 %v478_v13, %v580_v46  ;;  %v170_v7 = vmul.f32 %v585_v47, %v495_v19  ;;  %917 = vst [vmem:[#allocation11_spill] sm:$0xff] %v637_v11  ;;  %v199_v17 = vmul.f32 %v596_v52, %v512_v23 }
  0x2c   :  { %v143_v55 = vadd.f32 %v138_v29, %v114_v42  ;;  %v144_v61 = vadd.f32 %v139_v38, %v115_v48  ;;  %v54_v18 = vmul.f32 %v601_v53, %v451_v4  ;;  %v83_v26 = vmul.f32 %v606_v54, %v465_v8  ;;  %918 = vst [vmem:[#allocation12_spill] sm:$0xff] %v648_v28  ;;  %v653_v29 = vld [vmem:[%s903_s0 + $0x50] sm:$0x1f]  ;;  %v666_v42 = vld [vmem:[%s903_s0 + $0x29] sm:$0x1f] }
  0x2d   :  { %919 = vst [vmem:[#allocation13_spill] sm:$0xff] %v653_v29  ;;  %v87_v36 = vadd.f32 %v82_v51, %v58_v62  ;;  %v229_v37 = vmul.f32 %v617_v59, %v514_v24  ;;  %v661_v38 = vmul.f32 %v622_v60, %v531_v31  ;;  %v671_v48 = vld [vmem:[%s903_s0 + $0x28] sm:$0x1f]  ;;  %v112_v51 = vmul.f32 %v476_v12, %v632_v10  ;;  %v699_v59 = vld [vmem:[%s903_s0 + $0x21] sm:$0x1f] }
  0x2e   :  { %v173_v16 = vadd.f32 %v168_v30, %v143_v55  ;;  %v174_v30 = vadd.f32 %v169_v45, %v144_v61  ;;  %v59_v50 = vadd.f32 %v54_v18, %v449_v3  ;;  %v141_v55 = vmul.f32 %v478_v13, %v637_v11  ;;  %v683_v61 = vld [vmem:[%s903_s0 + $0x49] sm:$0x1f] }
  0x2f   :  { %v688_v62 = vld [vmem:[%s903_s0 + $0x48] sm:$0x1f]  ;;  %v171_v18 = vmul.f32 %v648_v28, %v495_v19  ;;  %v200_v60 = vmul.f32 %v653_v29, %v512_v23 }
  0x30   :  { %v202_v45 = vadd.f32 %v197_v35, %v173_v16  ;;  %920 = vst [vmem:[#allocation14_spill] sm:$0xff] %v688_v62  ;;  %v203_v35 = vadd.f32 %v198_v49, %v174_v30  ;;  %v116_v16 = vadd.f32 %v111_v58, %v87_v36  ;;  %v88_v11 = vadd.f32 %v83_v26, %v59_v50  ;;  %v712_v30 = vld [vmem:[%s903_s0 + $0x20] sm:$0x1f]  ;;  %v717_v36 = vld [vmem:[%s903_s0 + $0x59] sm:$0x1f] }
  0x31   :  { %v55_v49 = vmul.f32 %v666_v42, %v451_v4  ;;  %v84_v58 = vmul.f32 %v671_v48, %v465_v8  ;;  %v259_v4 = vmul.f32 %v688_v62, %v531_v31  ;;  %v726_v8 = vld [vmem:[%s903_s0 + $0x58] sm:$0x1f]  ;;  %v172_v62 = vmul.f32 %v717_v36, %v495_v19  ;;  %v753_v19 = vld [vmem:[%s903_s0 + $0x51] sm:$0x1f] }
  0x32   :  { %v232_v40 = vadd.f32 %v227_v43, %v202_v45  ;;  %v233_v29 = vadd.f32 %v228_v56, %v203_v35  ;;  %v145_v28 = vadd.f32 %v140_v63, %v116_v16  ;;  %v230_v43 = vmul.f32 %v683_v61, %v514_v24 }
  0x33   :  { %v117_v45 = vadd.f32 %v112_v51, %v88_v11  ;;  %v60_v56 = vadd.f32 %v55_v49, %v449_v3  ;;  %v113_v63 = vmul.f32 %v476_v12, %v699_v59  ;;  %v142_v16 = vmul.f32 %v478_v13, %v712_v30 }
  0x34   :  { %v261_v26 = vadd.f32 %v573_v44, %v232_v40  ;;  %v262_v50 = vadd.f32 %v257_v57, %v233_v29  ;;  %v175_v35 = vadd.f32 %v170_v7, %v145_v28  ;;  %v201_v3 = vmul.f32 %v726_v8, %v512_v23 }
  0x35   :  { %v146_v40 = vadd.f32 %v141_v55, %v117_v45  ;;  %v89_v44 = vadd.f32 %v84_v58, %v60_v56  ;;  %v743_v11 = vstv %s655_s4  ;;  %v746_v57 = vstv %s673_s9  ;;  %v773_v58 = vld [vmem:[%s903_s0 + $0x50] sm:$0x1f] }
  0x36   :  { %358 = vtanh.f32 %v261_v26  ;;  %v204_v12 = vadd.f32 %v199_v17, %v175_v35  ;;  %v63_v28 = vmul.f32 %v437_v0, %v746_v57  ;;  %v758_v23 = vstv %s690_s14 }
  0x37   :  { %360 = vtanh.f32 %v262_v50  ;;  %v176_v13 = vadd.f32 %v171_v18, %v146_v40  ;;  %v118_v7 = vadd.f32 %v113_v63, %v89_v44  ;;  %v92_v29 = vmul.f32 %v442_v1, %v758_v23 }
  0x38   :  { %v234_v17 = vadd.f32 %v229_v37, %v204_v12  ;;  %v765_v51 = vstv %s701_s17  ;;  %v768_v55 = vstv %s703_s18  ;;  %v68_v0 = vadd.f32 %v63_v28, %v743_v11 }
  0x39   :  { %v205_v18 = vadd.f32 %v200_v60, %v176_v13  ;;  %v147_v49 = vadd.f32 %v142_v16, %v118_v7  ;;  %v121_v37 = vmul.f32 %v765_v51, %v456_v5  ;;  %v231_v1 = vmul.f32 %v753_v19, %v514_v24 }
  0x3a   :  { %v263_v26 = vadd.f32 %v661_v38, %v234_v17  ;;  %v150_v60 = vmul.f32 %v768_v55, %v470_v9  ;;  %v784_v45 = vstv %s728_s23  ;;  %v97_v50 = vadd.f32 %v92_v29, %v68_v0 }
  0x3b   :  { %v235_v56 = vadd.f32 %v230_v43, %v205_v18  ;;  %v177_v63 = vadd.f32 %v172_v62, %v147_v49  ;;  %v787_v35 = vstv %s734_s24  ;;  %v260_v5 = vmul.f32 %v773_v58, %v531_v31 }
  0x3c   :  { %362 = vtanh.f32 %v263_v26  ;;  %v126_v40 = vadd.f32 %v121_v37, %v97_v50  ;;  %v180_v24 = vmul.f32 %v483_v14, %v784_v45  ;;  %v209_v9 = vmul.f32 %v488_v15, %v787_v35 }
  0x3d   :  { %v264_v16 = vadd.f32 %v259_v4, %v235_v56  ;;  %v206_v38 = vadd.f32 %v201_v3, %v177_v63  ;;  %v796_v44 = vstv %s748_s25  ;;  %v64_v62 = vmul.f32 %v447_v2, %v746_v57 }
  0x3e   :  { %v93_v43 = vmul.f32 %v461_v6, %v758_v23  ;;  %v155_v4 = vadd.f32 %v150_v60, %v126_v40  ;;  %v803_v3 = vstv %s760_s28  ;;  %v122_v15 = vmul.f32 %v765_v51, %v505_v21 }
  0x3f   :  { %364 = vtanh.f32 %v264_v16  ;;  %v236_v31 = vadd.f32 %v231_v1, %v206_v38  ;;  %v69_v14 = vadd.f32 %v64_v62, %v743_v11  ;;  %v239_v7 = vmul.f32 %v500_v20, %v796_v44  ;;  %v921_v16 = vld [vmem:[#allocation11_spill] sm:$0xff] }
  0x40   :  { %v359_v12 = vpop.eup %358  ;;  %v185_v6 = vadd.f32 %v180_v24, %v155_v4  ;;  %v65_v28 = vmul.f32 %v541_v33, %v746_v57  ;;  %v268_v17 = vmul.f32 %v519_v25, %v803_v3  ;;  %v151_v18 = vmul.f32 %v768_v55, %v510_v22 }
  0x41   :  { %v361_v13 = vpop.eup %360  ;;  %283 = vst [vmem:[%s906_s3] sm:$0x1f] %v359_v12  ;;  %v265_v2 = vadd.f32 %v260_v5, %v236_v31  ;;  %v98_v29 = vadd.f32 %v93_v43, %v69_v14  ;;  %v94_v21 = vmul.f32 %v546_v34, %v758_v23  ;;  %v123_v20 = vmul.f32 %v765_v51, %v567_v41  ;;  %v923_v12 = vld [vmem:[#allocation9_spill] sm:$0xff] }
  0x42   :  { %284 = vst [vmem:[%s906_s3 + $0x8] sm:$0x1f] %v361_v13  ;;  %v214_v49 = vadd.f32 %v209_v9, %v185_v6  ;;  %v70_v0 = vadd.f32 %v65_v28, %v743_v11  ;;  %v181_v33 = vmul.f32 %v525_v27, %v784_v45  ;;  %v152_v25 = vmul.f32 %v768_v55, %v580_v46 }
  0x43   :  { %366 = vtanh.f32 %v265_v2  ;;  %v127_v37 = vadd.f32 %v122_v15, %v98_v29  ;;  %v66_v22 = vmul.f32 %v601_v53, %v746_v57  ;;  %v95_v34 = vmul.f32 %v606_v54, %v758_v23 }
  0x44   :  { %v244_v26 = vadd.f32 %v239_v7, %v214_v49  ;;  %v99_v1 = vadd.f32 %v94_v21, %v70_v0  ;;  %v210_v41 = vmul.f32 %v536_v32, %v787_v35  ;;  %v240_v63 = vmul.f32 %v557_v39, %v796_v44 }
  0x45   :  { %v156_v56 = vadd.f32 %v151_v18, %v127_v37  ;;  %v182_v27 = vmul.f32 %v585_v47, %v784_v45  ;;  %v71_v50 = vadd.f32 %v66_v22, %v743_v11  ;;  %v124_v54 = vmul.f32 %v765_v51, %v632_v10 }
  0x46   :  { %v363_v60 = vpop.eup %362  ;;  %v273_v46 = vadd.f32 %v268_v17, %v244_v26  ;;  %v128_v53 = vadd.f32 %v123_v20, %v99_v1  ;;  %v211_v32 = vmul.f32 %v596_v52, %v787_v35  ;;  %v153_v39 = vmul.f32 %v768_v55, %v921_v16  ;;  %v922_v52 = vld [vmem:[#allocation8_spill] sm:$0xff] }
  0x47   :  { %285 = vst [vmem:[%s906_s3 + $0x10] sm:$0x1f] %v363_v60  ;;  %v186_v5 = vadd.f32 %v181_v33, %v156_v56  ;;  %v67_v47 = vmul.f32 %v666_v42, %v746_v57  ;;  %v100_v24 = vadd.f32 %v95_v34, %v71_v50  ;;  %v96_v9 = vmul.f32 %v671_v48, %v758_v23  ;;  %v924_v48 = vld [vmem:[#allocation12_spill] sm:$0xff]  ;;  %v927_v33 = vld [vmem:[#allocation14_spill] sm:$0xff] }
  0x48   :  { %368 = vtanh.f32 %v273_v46  ;;  %v157_v40 = vadd.f32 %v152_v25, %v128_v53  ;;  %v269_v62 = vmul.f32 %v922_v52, %v803_v3  ;;  %v125_v42 = vmul.f32 %v765_v51, %v699_v59  ;;  %v926_v59 = vld [vmem:[#allocation13_spill] sm:$0xff] }
  0x49   :  { %v365_v38 = vpop.eup %364  ;;  %v215_v10 = vadd.f32 %v210_v41, %v186_v5  ;;  %v72_v43 = vadd.f32 %v67_v47, %v743_v11  ;;  %v241_v31 = vmul.f32 %v923_v12, %v796_v44  ;;  %v129_v4 = vadd.f32 %v124_v54, %v100_v24  ;;  %v925_v11 = vld [vmem:[#allocation10_spill] sm:$0xff] }
  0x4a   :  { %286 = vst [vmem:[%s906_s3 + $0x18] sm:$0x1f] %v365_v38  ;;  %v187_v57 = vadd.f32 %v182_v27, %v157_v40  ;;  %v183_v23 = vmul.f32 %v924_v48, %v784_v45  ;;  %v154_v15 = vmul.f32 %v768_v55, %v712_v30  ;;  %v270_v7 = vmul.f32 %v925_v11, %v803_v3 }
  0x4b   :  { %v245_v13 = vadd.f32 %v240_v63, %v215_v10  ;;  %v101_v14 = vadd.f32 %v96_v9, %v72_v43  ;;  %v158_v28 = vadd.f32 %v153_v39, %v129_v4  ;;  %v212_v51 = vmul.f32 %v926_v59, %v787_v35 }
  0x4c   :  { %v216_v6 = vadd.f32 %v211_v32, %v187_v57  ;;  %v184_v18 = vmul.f32 %v717_v36, %v784_v45  ;;  %v242_v55 = vmul.f32 %v683_v61, %v796_v44  ;;  %v213_v0 = vmul.f32 %v726_v8, %v787_v35 }
  0x4d   :  { %v367_v2 = vpop.eup %366  ;;  %v274_v17 = vadd.f32 %v269_v62, %v245_v13  ;;  %v130_v29 = vadd.f32 %v125_v42, %v101_v14  ;;  %v188_v30 = vadd.f32 %v183_v23, %v158_v28  ;;  %v271_v25 = vmul.f32 %v927_v33, %v803_v3 }
  0x4e   :  { %287 = vst [vmem:[%s906_s3 + $0x20] sm:$0x1f] %v367_v2  ;;  %v246_v21 = vadd.f32 %v241_v31, %v216_v6  ;;  %v243_v1 = vmul.f32 %v753_v19, %v796_v44  ;;  %v272_v8 = vmul.f32 %v773_v58, %v803_v3 }
  0x4f   :  { %370 = vtanh.f32 %v274_v17  ;;  %v159_v49 = vadd.f32 %v154_v15, %v130_v29  ;;  %v217_v37 = vadd.f32 %v212_v51, %v188_v30 }
  0x50   :  { %v275_v20 = vadd.f32 %v270_v7, %v246_v21 }
  0x51   :  { %v189_v26 = vadd.f32 %v184_v18, %v159_v49  ;;  %v247_v45 = vadd.f32 %v242_v55, %v217_v37 }
  0x52   :  { %v369_v36 = vpop.eup %368  ;;  %372 = vtanh.f32 %v275_v20 }
  0x53   :  { %351 = vst [vmem:[%s906_s3 + $0x28] sm:$0x1f] %v369_v36  ;;  %v218_v61 = vadd.f32 %v213_v0, %v189_v26  ;;  %v276_v35 = vadd.f32 %v271_v25, %v247_v45 }
  0x55   :  { %v248_v22 = vadd.f32 %v243_v1, %v218_v61  ;;  %374 = vtanh.f32 %v276_v35 }
  0x57   :  { %v277_v34 = vadd.f32 %v272_v8, %v248_v22 }
  0x59   :  { %v371_v60 = vpop.eup %370  ;;  %376 = vtanh.f32 %v277_v34 }
  0x5a   :  { %352 = vst [vmem:[%s906_s3 + $0x30] sm:$0x1f] %v371_v60 }
  0x5c   :  { %v373_v19 = vpop.eup %372 }
  0x5d   :  { %353 = vst [vmem:[%s906_s3 + $0x38] sm:$0x1f] %v373_v19 }
  0x5f   :  { %v375_v44 = vpop.eup %374 }
  0x60   :  { %354 = vst [vmem:[%s906_s3 + $0x40] sm:$0x1f] %v375_v44 }
  0x63   :  { %v377_v58 = vpop.eup %376 }
  0x64   :  { %355 = vst [vmem:[%s906_s3 + $0x48] sm:$0x1f] %v377_v58 }
  0x65   :  { %303 = vsyncpa [#allocation3], 1 }
  0x66   :  { %304 = vsyncpa [#allocation5], 1 }

</bundles_post_ra>
